<compile_context>
chip_gen: v5e
topology: v5e:2x2
jax: 0.10.0
libtpu: 0.0.40
codegen_flags: <defaults>
</compile_context>

<pallas_src>
import jax
import jax.numpy as jnp
from jax import lax
from jax.experimental import pallas as pl
from jax.experimental.pallas import tpu as pltpu

_ROW0 = 16  # aligned start row of the data region inside the row scratches


def double_conv_kernel(x_ref, w1_ref, b1_ref, w2_ref, b2_ref, o_ref,
                       xpad_ref, apad_ref):
    # x_ref : (1, H, W*Cin)        bf16 rows of one image (W,Cin folded on lanes)
    # w1_ref: (3, W*Cin, W*Cout)   bf16 block-banded weights, one per ky tap
    # b1_ref: (1, W*Cout)          f32 bias tiled along W
    # w2_ref: (3, W*Cout, W*Cout)  bf16
    # b2_ref: (1, W*Cout)          f32
    # o_ref : (1, H, W*Cout)       f32 lane-dense output rows
    # xpad_ref / apad_ref: (_ROW0+H+8, .) bf16 scratches; data at rows
    #                      [_ROW0, _ROW0+H), halo rows _ROW0-1 and _ROW0+H.
    H = o_ref.shape[1]
    wco = o_ref.shape[2]

    # Stage the image rows at an aligned offset; zero only the two halo rows
    # that the +/-1 row taps read (cheap, and correct regardless of how the
    # parallel batch axis is split across cores -- no "init once" guard).
    xpad_ref[pl.ds(_ROW0 - 1, 1), :] = jnp.zeros((1, xpad_ref.shape[1]),
                                                 xpad_ref.dtype)
    xpad_ref[pl.ds(_ROW0 + H, 1), :] = jnp.zeros((1, xpad_ref.shape[1]),
                                                 xpad_ref.dtype)
    xpad_ref[pl.ds(_ROW0, H), :] = x_ref[0]

    # ---- conv1 + bias + ReLU: 3 ky-tap matmuls, f32 accumulation ----
    acc1 = jnp.zeros((H, wco), jnp.float32)
    for ky in range(3):
        lhs = xpad_ref[pl.ds(_ROW0 - 1 + ky, H), :]
        acc1 += jnp.dot(lhs, w1_ref[ky], preferred_element_type=jnp.float32)
    act1 = jnp.maximum(acc1 + b1_ref[0], 0.0)

    # Stash the (already lane-dense) activation at an aligned row offset.
    apad_ref[pl.ds(_ROW0 - 1, 1), :] = jnp.zeros((1, wco), apad_ref.dtype)
    apad_ref[pl.ds(_ROW0 + H, 1), :] = jnp.zeros((1, wco), apad_ref.dtype)
    apad_ref[pl.ds(_ROW0, H), :] = act1.astype(apad_ref.dtype)

    # ---- conv2 + bias + ReLU ----
    acc2 = jnp.zeros((H, wco), jnp.float32)
    for ky in range(3):
        lhs = apad_ref[pl.ds(_ROW0 - 1 + ky, H), :]
        acc2 += jnp.dot(lhs, w2_ref[ky], preferred_element_type=jnp.float32)
    o_ref[0] = jnp.maximum(acc2 + b2_ref[0], 0.0).astype(o_ref.dtype)


def _band_weights(w_hwio, width):
    """(3,3,Ci,Co) HWIO -> (3, width*Ci, width*Co) block-banded per-ky matrices.

    band[ky][wi*Ci+ci, wo*Co+co] = w_hwio[ky, wi-wo+1, ci, co] when |wi-wo|<=1,
    else 0.  This folds the kx taps and the zero padding along W into the
    weights, so each conv is just 3 lane-dense row-band matmuls.
    """
    per_ky = []
    for ky in range(3):
        m = jnp.zeros((width * w_hwio.shape[2], width * w_hwio.shape[3]),
                      jnp.float32)
        for kx in range(3):
            sel = jnp.eye(width, k=-(kx - 1), dtype=jnp.float32)
            m = m + jnp.kron(sel, w_hwio[ky, kx].astype(jnp.float32))
        per_ky.append(m)
    return jnp.stack(per_ky)


def double_convolution(x_nchw, w1, b1, w2, b2):
    """x_nchw: (N,Cin,H,W); w1: (Cout,Cin,3,3); b1: (Cout,); w2: (Cout,Cout,3,3)."""
    N, Cin, H, W = x_nchw.shape
    Cout = w1.shape[0]
    wci, wco = W * Cin, W * Cout
    scr_h = _ROW0 + H + 8

    # NCHW -> (N, H, W*Cin) rows; bf16 on the MXU path (accumulation stays f32).
    x_rows = (jnp.transpose(x_nchw, (0, 2, 3, 1))
              .reshape(N, H, wci).astype(jnp.bfloat16))

    w1_band = _band_weights(jnp.transpose(w1, (2, 3, 1, 0)), W).astype(jnp.bfloat16)
    w2_band = _band_weights(jnp.transpose(w2, (2, 3, 1, 0)), W).astype(jnp.bfloat16)
    b1_row = jnp.tile(b1.astype(jnp.float32), W).reshape(1, wco)
    b2_row = jnp.tile(b2.astype(jnp.float32), W).reshape(1, wco)

    flops = 2 * N * H * W * 9 * (Cin * Cout + Cout * Cout)
    bytes_accessed = (x_rows.size * 2 + w1_band.size * 2 + w2_band.size * 2
                      + (b1_row.size + b2_row.size) * 4 + N * H * wco * 4)

    out_rows = pl.pallas_call(
        double_conv_kernel,
        out_shape=jax.ShapeDtypeStruct((N, H, wco), jnp.float32),
        grid_spec=pltpu.PrefetchScalarGridSpec(
            num_scalar_prefetch=0,
            grid=(N,),
            in_specs=[
                pl.BlockSpec((1, H, wci), lambda n: (n, 0, 0)),
                pl.BlockSpec((3, wci, wco), lambda n: (0, 0, 0)),
                pl.BlockSpec((1, wco), lambda n: (0, 0)),
                pl.BlockSpec((3, wco, wco), lambda n: (0, 0, 0)),
                pl.BlockSpec((1, wco), lambda n: (0, 0)),
            ],
            out_specs=pl.BlockSpec((1, H, wco), lambda n: (n, 0, 0)),
            scratch_shapes=[
                pltpu.VMEM((scr_h, wci), jnp.bfloat16),
                pltpu.VMEM((scr_h, wco), jnp.bfloat16),
            ],
        ),
        compiler_params=pltpu.CompilerParams(
            dimension_semantics=("parallel",)),
        cost_estimate=pl.CostEstimate(flops=flops, transcendentals=0,
                                      bytes_accessed=bytes_accessed),
    )(x_rows, w1_band, b1_row, w2_band, b2_row)

    return jnp.transpose(out_rows.reshape(N, H, W, Cout), (0, 3, 1, 2))


def _reference(x, w1, b1, w2, b2, *, match_bf16):
    """XLA conv reference; optionally rounds inputs/weights/intermediate to
    bf16 (f32 accumulation) to mirror the kernel's mixed-precision path."""
    rnd = ((lambda a: a.astype(jnp.bfloat16).astype(jnp.float32))
           if match_bf16 else (lambda a: a))
    dn = ("NCHW", "OIHW", "NCHW")
    y = lax.conv_general_dilated(rnd(x), rnd(w1), (1, 1), ((1, 1), (1, 1)),
                                 dimension_numbers=dn)
    y = jnp.maximum(y + b1[None, :, None, None], 0.0)
    y = lax.conv_general_dilated(rnd(y), rnd(w2), (1, 1), ((1, 1), (1, 1)),
                                 dimension_numbers=dn)
    return jnp.maximum(y + b2[None, :, None, None], 0.0)


if __name__ == "__main__":
    N, Cin, Cout, H, W = 2, 4, 8, 16, 16

    key = jax.random.PRNGKey(0)
    k_x, kw1, kb1, kw2, kb2 = jax.random.split(key, 5)
    x = jax.random.normal(k_x, (N, Cin, H, W), jnp.float32)
    w1 = jax.random.normal(kw1, (Cout, Cin, 3, 3), jnp.float32) * 0.1
    b1 = jax.random.normal(kb1, (Cout,), jnp.float32) * 0.1
    w2 = jax.random.normal(kw2, (Cout, Cout, 3, 3), jnp.float32) * 0.1
    b2 = jax.random.normal(kb2, (Cout,), jnp.float32) * 0.1

    out = jax.block_until_ready(double_convolution(x, w1, b1, w2, b2))
    assert out.shape == (N, Cout, H, W), out.shape

    # Tight check against a reference using the same bf16 rounding of
    # x / weights / intermediate activation (f32 accumulation).
    ref_bf = _reference(x, w1, b1, w2, b2, match_bf16=True)
    err_bf = float(jnp.max(jnp.abs(out - ref_bf)))
    assert jnp.allclose(out, ref_bf, atol=1e-2, rtol=1e-2), err_bf

    # Looser sanity check against the full-f32 reference.
    ref_f32 = _reference(x, w1, b1, w2, b2, match_bf16=False)
    err_f32 = float(jnp.max(jnp.abs(out - ref_f32)))
    assert jnp.allclose(out, ref_f32, atol=6e-2, rtol=6e-2), err_f32

    print("KERNEL_OK")
</pallas_src>

<mosaic_0001>
module attributes {stable_mosaic.version = 11 : i64} {
  func.func @double_conv_kernel(%arg0: i32, %arg1: memref<1x16x64xbf16, #tpu.memory_space<vmem>>, %arg2: memref<3x64x128xbf16, #tpu.memory_space<vmem>>, %arg3: memref<1x128xf32, #tpu.memory_space<vmem>>, %arg4: memref<3x128x128xbf16, #tpu.memory_space<vmem>>, %arg5: memref<1x128xf32, #tpu.memory_space<vmem>>, %arg6: memref<1x16x128xf32, #tpu.memory_space<vmem>>, %arg7: memref<40x64xbf16, #tpu.memory_space<vmem>>, %arg8: memref<40x128xbf16, #tpu.memory_space<vmem>>) attributes {dimension_semantics = [#tpu.dimension_semantics<parallel>], iteration_bounds = array<i64: 2>, scalar_prefetch = 0 : i64, scratch_operands = 2 : i64, tpu.core_type = #tpu.core_type<tc>, window_params = [{transform_indices = @transform_0, window_bounds = array<i64: 1, 16, 64>}, {pipeline_mode = #tpu.pipeline_mode<synchronous>, transform_indices = @transform_1, window_bounds = array<i64: 3, 64, 128>}, {pipeline_mode = #tpu.pipeline_mode<synchronous>, transform_indices = @transform_2, window_bounds = array<i64: 1, 128>}, {pipeline_mode = #tpu.pipeline_mode<synchronous>, transform_indices = @transform_3, window_bounds = array<i64: 3, 128, 128>}, {pipeline_mode = #tpu.pipeline_mode<synchronous>, transform_indices = @transform_4, window_bounds = array<i64: 1, 128>}, {transform_indices = @transform_5, window_bounds = array<i64: 1, 16, 128>}]} {
    %cst = arith.constant 0.000000e+00 : bf16
    %0 = vector.broadcast %cst : bf16 to vector<1x64xbf16>
    %c15 = arith.constant 15 : index
    %c0 = arith.constant 0 : index
    %1 = vector.load %arg7[%c15, %c0] : memref<40x64xbf16, #tpu.memory_space<vmem>>, vector<1x64xbf16>
    tpu.vector_store %arg7[%c15, %c0], %0 {strides = array<i32>} : memref<40x64xbf16, #tpu.memory_space<vmem>>, vector<1x64xbf16>,
    %cst_0 = arith.constant 0.000000e+00 : bf16
    %2 = vector.broadcast %cst_0 : bf16 to vector<1x64xbf16>
    %c32 = arith.constant 32 : index
    %c0_1 = arith.constant 0 : index
    %3 = vector.load %arg7[%c32, %c0_1] : memref<40x64xbf16, #tpu.memory_space<vmem>>, vector<1x64xbf16>
    tpu.vector_store %arg7[%c32, %c0_1], %2 {strides = array<i32>} : memref<40x64xbf16, #tpu.memory_space<vmem>>, vector<1x64xbf16>,
    %c0_2 = arith.constant 0 : index
    %c0_3 = arith.constant 0 : index
    %c0_4 = arith.constant 0 : index
    %4 = vector.load %arg1[%c0_2, %c0_3, %c0_4] : memref<1x16x64xbf16, #tpu.memory_space<vmem>>, vector<1x16x64xbf16>
    %5 = vector.shape_cast %4 : vector<1x16x64xbf16> to vector<16x64xbf16>
    %c16 = arith.constant 16 : index
    %c0_5 = arith.constant 0 : index
    %6 = vector.load %arg7[%c16, %c0_5] : memref<40x64xbf16, #tpu.memory_space<vmem>>, vector<16x64xbf16>
    tpu.vector_store %arg7[%c16, %c0_5], %5 {strides = array<i32>} : memref<40x64xbf16, #tpu.memory_space<vmem>>, vector<16x64xbf16>,
    %cst_6 = arith.constant 0.000000e+00 : f32
    %7 = vector.broadcast %cst_6 : f32 to vector<16x128xf32>
    %c15_7 = arith.constant 15 : index
    %c0_8 = arith.constant 0 : index
    %8 = vector.load %arg7[%c15_7, %c0_8] : memref<40x64xbf16, #tpu.memory_space<vmem>>, vector<16x64xbf16>
    %c0_9 = arith.constant 0 : index
    %c0_10 = arith.constant 0 : index
    %c0_11 = arith.constant 0 : index
    %9 = vector.load %arg2[%c0_9, %c0_10, %c0_11] : memref<3x64x128xbf16, #tpu.memory_space<vmem>>, vector<1x64x128xbf16>
    %10 = vector.shape_cast %9 : vector<1x64x128xbf16> to vector<64x128xbf16>
    %cst_12 = arith.constant dense<0.000000e+00> : vector<16x128xf32>
    %11 = tpu.matmul %8, %10, %cst_12 {dimension_numbers = #tpu.dot_dimension_numbers<[1], [0], [0], [1], [0, 0, 1, 1], [], []>} : vector<16x64xbf16>, vector<64x128xbf16>, vector<16x128xf32> -> vector<16x128xf32>
    %12 = arith.addf %7, %11 : vector<16x128xf32>
    %c16_13 = arith.constant 16 : index
    %c0_14 = arith.constant 0 : index
    %13 = vector.load %arg7[%c16_13, %c0_14] : memref<40x64xbf16, #tpu.memory_space<vmem>>, vector<16x64xbf16>
    %c1 = arith.constant 1 : index
    %c0_15 = arith.constant 0 : index
    %c0_16 = arith.constant 0 : index
    %14 = vector.load %arg2[%c1, %c0_15, %c0_16] : memref<3x64x128xbf16, #tpu.memory_space<vmem>>, vector<1x64x128xbf16>
    %15 = vector.shape_cast %14 : vector<1x64x128xbf16> to vector<64x128xbf16>
    %cst_17 = arith.constant dense<0.000000e+00> : vector<16x128xf32>
    %16 = tpu.matmul %13, %15, %cst_17 {dimension_numbers = #tpu.dot_dimension_numbers<[1], [0], [0], [1], [0, 0, 1, 1], [], []>} : vector<16x64xbf16>, vector<64x128xbf16>, vector<16x128xf32> -> vector<16x128xf32>
    %17 = arith.addf %12, %16 : vector<16x128xf32>
    %c17 = arith.constant 17 : index
    %c0_18 = arith.constant 0 : index
    %18 = vector.load %arg7[%c17, %c0_18] : memref<40x64xbf16, #tpu.memory_space<vmem>>, vector<16x64xbf16>
    %c2 = arith.constant 2 : index
    %c0_19 = arith.constant 0 : index
    %c0_20 = arith.constant 0 : index
    %19 = vector.load %arg2[%c2, %c0_19, %c0_20] : memref<3x64x128xbf16, #tpu.memory_space<vmem>>, vector<1x64x128xbf16>
    %20 = vector.shape_cast %19 : vector<1x64x128xbf16> to vector<64x128xbf16>
    %cst_21 = arith.constant dense<0.000000e+00> : vector<16x128xf32>
    %21 = tpu.matmul %18, %20, %cst_21 {dimension_numbers = #tpu.dot_dimension_numbers<[1], [0], [0], [1], [0, 0, 1, 1], [], []>} : vector<16x64xbf16>, vector<64x128xbf16>, vector<16x128xf32> -> vector<16x128xf32>
    %22 = arith.addf %17, %21 : vector<16x128xf32>
    %c0_22 = arith.constant 0 : index
    %c0_23 = arith.constant 0 : index
    %23 = vector.load %arg3[%c0_22, %c0_23] : memref<1x128xf32, #tpu.memory_space<vmem>>, vector<1x128xf32>
    %24 = vector.shape_cast %23 : vector<1x128xf32> to vector<128xf32>
    %25 = vector.shape_cast %24 : vector<128xf32> to vector<1x128xf32>
    %26 = vector.broadcast %25 : vector<1x128xf32> to vector<16x128xf32>
    %27 = arith.addf %22, %26 : vector<16x128xf32>
    %cst_24 = arith.constant 0.000000e+00 : f32
    %28 = vector.broadcast %cst_24 : f32 to vector<16x128xf32>
    %29 = arith.maximumf %27, %28 : vector<16x128xf32>
    %cst_25 = arith.constant 0.000000e+00 : bf16
    %30 = vector.broadcast %cst_25 : bf16 to vector<1x128xbf16>
    %c15_26 = arith.constant 15 : index
    %c0_27 = arith.constant 0 : index
    %31 = vector.load %arg8[%c15_26, %c0_27] : memref<40x128xbf16, #tpu.memory_space<vmem>>, vector<1x128xbf16>
    tpu.vector_store %arg8[%c15_26, %c0_27], %30 {strides = array<i32>} : memref<40x128xbf16, #tpu.memory_space<vmem>>, vector<1x128xbf16>,
    %cst_28 = arith.constant 0.000000e+00 : bf16
    %32 = vector.broadcast %cst_28 : bf16 to vector<1x128xbf16>
    %c32_29 = arith.constant 32 : index
    %c0_30 = arith.constant 0 : index
    %33 = vector.load %arg8[%c32_29, %c0_30] : memref<40x128xbf16, #tpu.memory_space<vmem>>, vector<1x128xbf16>
    tpu.vector_store %arg8[%c32_29, %c0_30], %32 {strides = array<i32>} : memref<40x128xbf16, #tpu.memory_space<vmem>>, vector<1x128xbf16>,
    %34 = arith.truncf %29 : vector<16x128xf32> to vector<16x128xbf16>
    %c16_31 = arith.constant 16 : index
    %c0_32 = arith.constant 0 : index
    %35 = vector.load %arg8[%c16_31, %c0_32] : memref<40x128xbf16, #tpu.memory_space<vmem>>, vector<16x128xbf16>
    tpu.vector_store %arg8[%c16_31, %c0_32], %34 {strides = array<i32>} : memref<40x128xbf16, #tpu.memory_space<vmem>>, vector<16x128xbf16>,
    %cst_33 = arith.constant 0.000000e+00 : f32
    %36 = vector.broadcast %cst_33 : f32 to vector<16x128xf32>
    %c15_34 = arith.constant 15 : index
    %c0_35 = arith.constant 0 : index
    %37 = vector.load %arg8[%c15_34, %c0_35] : memref<40x128xbf16, #tpu.memory_space<vmem>>, vector<16x128xbf16>
    %c0_36 = arith.constant 0 : index
    %c0_37 = arith.constant 0 : index
    %c0_38 = arith.constant 0 : index
    %38 = vector.load %arg4[%c0_36, %c0_37, %c0_38] : memref<3x128x128xbf16, #tpu.memory_space<vmem>>, vector<1x128x128xbf16>
    %39 = vector.shape_cast %38 : vector<1x128x128xbf16> to vector<128x128xbf16>
    %cst_39 = arith.constant dense<0.000000e+00> : vector<16x128xf32>
    %40 = tpu.matmul %37, %39, %cst_39 {dimension_numbers = #tpu.dot_dimension_numbers<[1], [0], [0], [1], [0, 0, 1, 1], [], []>} : vector<16x128xbf16>, vector<128x128xbf16>, vector<16x128xf32> -> vector<16x128xf32>
    %41 = arith.addf %36, %40 : vector<16x128xf32>
    %c16_40 = arith.constant 16 : index
    %c0_41 = arith.constant 0 : index
    %42 = vector.load %arg8[%c16_40, %c0_41] : memref<40x128xbf16, #tpu.memory_space<vmem>>, vector<16x128xbf16>
    %c1_42 = arith.constant 1 : index
    %c0_43 = arith.constant 0 : index
    %c0_44 = arith.constant 0 : index
    %43 = vector.load %arg4[%c1_42, %c0_43, %c0_44] : memref<3x128x128xbf16, #tpu.memory_space<vmem>>, vector<1x128x128xbf16>
    %44 = vector.shape_cast %43 : vector<1x128x128xbf16> to vector<128x128xbf16>
    %cst_45 = arith.constant dense<0.000000e+00> : vector<16x128xf32>
    %45 = tpu.matmul %42, %44, %cst_45 {dimension_numbers = #tpu.dot_dimension_numbers<[1], [0], [0], [1], [0, 0, 1, 1], [], []>} : vector<16x128xbf16>, vector<128x128xbf16>, vector<16x128xf32> -> vector<16x128xf32>
    %46 = arith.addf %41, %45 : vector<16x128xf32>
    %c17_46 = arith.constant 17 : index
    %c0_47 = arith.constant 0 : index
    %47 = vector.load %arg8[%c17_46, %c0_47] : memref<40x128xbf16, #tpu.memory_space<vmem>>, vector<16x128xbf16>
    %c2_48 = arith.constant 2 : index
    %c0_49 = arith.constant 0 : index
    %c0_50 = arith.constant 0 : index
    %48 = vector.load %arg4[%c2_48, %c0_49, %c0_50] : memref<3x128x128xbf16, #tpu.memory_space<vmem>>, vector<1x128x128xbf16>
    %49 = vector.shape_cast %48 : vector<1x128x128xbf16> to vector<128x128xbf16>
    %cst_51 = arith.constant dense<0.000000e+00> : vector<16x128xf32>
    %50 = tpu.matmul %47, %49, %cst_51 {dimension_numbers = #tpu.dot_dimension_numbers<[1], [0], [0], [1], [0, 0, 1, 1], [], []>} : vector<16x128xbf16>, vector<128x128xbf16>, vector<16x128xf32> -> vector<16x128xf32>
    %51 = arith.addf %46, %50 : vector<16x128xf32>
    %c0_52 = arith.constant 0 : index
    %c0_53 = arith.constant 0 : index
    %52 = vector.load %arg5[%c0_52, %c0_53] : memref<1x128xf32, #tpu.memory_space<vmem>>, vector<1x128xf32>
    %53 = vector.shape_cast %52 : vector<1x128xf32> to vector<128xf32>
    %54 = vector.shape_cast %53 : vector<128xf32> to vector<1x128xf32>
    %55 = vector.broadcast %54 : vector<1x128xf32> to vector<16x128xf32>
    %56 = arith.addf %51, %55 : vector<16x128xf32>
    %cst_54 = arith.constant 0.000000e+00 : f32
    %57 = vector.broadcast %cst_54 : f32 to vector<16x128xf32>
    %58 = arith.maximumf %56, %57 : vector<16x128xf32>
    %c0_55 = arith.constant 0 : index
    %c0_56 = arith.constant 0 : index
    %c0_57 = arith.constant 0 : index
    %59 = vector.load %arg6[%c0_55, %c0_56, %c0_57] : memref<1x16x128xf32, #tpu.memory_space<vmem>>, vector<1x16x128xf32>
    %60 = vector.shape_cast %59 : vector<1x16x128xf32> to vector<16x128xf32>
    %61 = vector.shape_cast %58 : vector<16x128xf32> to vector<1x16x128xf32>
    tpu.vector_store %arg6[%c0_55, %c0_56, %c0_57], %61 {strides = array<i32>} : memref<1x16x128xf32, #tpu.memory_space<vmem>>, vector<1x16x128xf32>,
    return
  }
  func.func @transform_0(%arg0: i32) -> (i32, i32, i32) {
    %c0_i32 = arith.constant 0 : i32
    %c0_i32_0 = arith.constant 0 : i32
    %c0_i32_1 = arith.constant 0 : i32
    return %arg0, %c0_i32, %c0_i32_0 : i32, i32, i32
  }
  func.func @transform_1(%arg0: i32) -> (i32, i32, i32) {
    %c0_i32 = arith.constant 0 : i32
    %c0_i32_0 = arith.constant 0 : i32
    %c0_i32_1 = arith.constant 0 : i32
    %c0_i32_2 = arith.constant 0 : i32
    return %c0_i32, %c0_i32_0, %c0_i32_1 : i32, i32, i32
  }
  func.func @transform_2(%arg0: i32) -> (i32, i32) {
    %c0_i32 = arith.constant 0 : i32
    %c0_i32_0 = arith.constant 0 : i32
    %c0_i32_1 = arith.constant 0 : i32
    return %c0_i32, %c0_i32_0 : i32, i32
  }
  func.func @transform_3(%arg0: i32) -> (i32, i32, i32) {
    %c0_i32 = arith.constant 0 : i32
    %c0_i32_0 = arith.constant 0 : i32
    %c0_i32_1 = arith.constant 0 : i32
    %c0_i32_2 = arith.constant 0 : i32
    return %c0_i32, %c0_i32_0, %c0_i32_1 : i32, i32, i32
  }
  func.func @transform_4(%arg0: i32) -> (i32, i32) {
    %c0_i32 = arith.constant 0 : i32
    %c0_i32_0 = arith.constant 0 : i32
    %c0_i32_1 = arith.constant 0 : i32
    return %c0_i32, %c0_i32_0 : i32, i32
  }
  func.func @transform_5(%arg0: i32) -> (i32, i32, i32) {
    %c0_i32 = arith.constant 0 : i32
    %c0_i32_0 = arith.constant 0 : i32
    %c0_i32_1 = arith.constant 0 : i32
    return %arg0, %c0_i32, %c0_i32_0 : i32, i32, i32
  }
}

</mosaic_0001>

<bundles_post_ra>
// kernel: tpu_custom_call.1
= control target key start
LH: loop header
LB: loop body
LE: loop exit
PB: predicated region body
PF: predicated region fallthrough
CT: control target
= control target key end

     0   :  { %10 = vsyncpa [#allocation5], 0  ;;  %s1619_s0 = inlined_call_operand.hbm [shape: bf16[2,16,64], index: 0, kind: input, shape index: {}]   ;;  %s1620_s1 = inlined_call_operand.hbm [shape: bf16[3,64,128], index: 1, kind: input, shape index: {}]   ;;  %s1621_s2 = inlined_call_operand.vmem [shape: f32[1,128], index: 2, kind: input, shape index: {}]   ;;  %s1622_s3 = inlined_call_operand.hbm [shape: bf16[3,128,128], index: 3, kind: input, shape index: {}]   ;;  %s1623_s4 = inlined_call_operand.vmem [shape: f32[1,128], index: 4, kind: input, shape index: {}]   ;;  %s1624_s5 = inlined_call_operand.hbm [shape: f32[2,16,128], index: 5, kind: output, shape index: {}]  }
   0x1   :  { %12 = vsyncpa [#allocation5 + $0x1], 0 }
   0x2   :  { %13 = vsyncpa [#allocation8], 0 }
   0x3   :  { %14 = vsyncpa [#allocation6], 0 }
   0x4   :  { %16 = vsyncpa [#allocation6 + $0x1], 0  ;;  %s1445_s18 = smov 0   ;;  %s1447_s19 = smov 0  }
   0x5   :  { %s1449_s20 = smov 0   ;;  %s1451_s21 = smov 0  }
   0x6 LB: > { %s1466_s22 = sadd.s32 4294967295, %s1407_s21   ;;  %s935_s23 = sadd.s32 4294967294, %s1407_s21   ;;  %s1407_s21 = sphi %s1451_s21, %s1638_s21   ;;  %s1403_s20 = sphi %s1449_s20, %s1637_s20   ;;  %s1399_s19 = sphi %s1447_s19, %s1636_s19   ;;  %s1395_s18 = sphi %s1445_s18, %s1635_s18  }
   0x7   : > { %p42_p0 = scmp.ne.s32.totalorder %s1399_s19, %s1395_s18  ;;  %p43_p1 = scmp.eq.s32.totalorder %s1466_s22, 0 }
   0x8   : > { %p150_p2 = scmp.eq.s32.totalorder %s1466_s22, 1  ;;  %p156_p3 = scmp.eq.s32.totalorder %s935_s23, 1 }
   0x9   : > { %p1475_p4 = por %p43_p1, %p42_p0  ;;  %p936_p5 = scmp.ge.s32.totalorder %s1407_s21, 1 }
   0xa   : > { %p1480_p6 = por %p156_p3, %p42_p0  ;;  %p163_p7 = scmp.lt.s32.totalorder %s1407_s21, 3 }
   0xb   : > { %s174_s28 = sshll.u32 %s1620_s1, 4  ;;  %s1409_s30 = smov [#allocation7]   ;;  %s175_s28 = int_to_ptr.hbm [resolvable:$true] %s174_s28 }
   0xc   : > { %p1488_p8 = pnand %p936_p5, %p163_p7  ;;  %s176_s6 = sshll.u32 %s1409_s30, 4  ;;  %s177_s6 = int_to_ptr.vmem [resolvable:$true] %s176_s6 }
   0xd   : > { %s191_s9 = sshll.u32 %s1622_s3, 4  ;;  %s1625_s10 = smov 64   ;;  %s192_s9 = int_to_ptr.hbm [resolvable:$true] %s191_s9 }
   0xe   : > { %p1186_p9 = pneg %p1488_p8  ;;  %s1411_s11 = smov 4  }
   0xf   : > { %s1412_s12 = smov [#allocation9]   ;;  %s1507_s14 = sadd.s32 1, %s1407_s21  }
  0x10   : > { %p1187_p10 = pnand %p1186_p9, %p43_p1  ;;  %s193_s13 = sshll.u32 %s1412_s12, 4  ;;  %s194_s13 = int_to_ptr.vmem [resolvable:$true] %s193_s13 }
  0x11   : > { %s29_s15 = sadd.s32 1, %s1403_s20  ;;  %s26_s16 = ssub.s32 %s1407_s21, %s1507_s14 }
  0x12   : > { %1189 = dma.hbm_to_vmem [thread:$0]  (!%p1187_p10), %s175_s28, 1536, %s177_s6, [#allocation8], %s1625_s10, %s1625_s10, %s1411_s11  }
  0x13   : > { %1192 = dma.hbm_to_vmem [thread:$0]  (!%p1187_p10), %s192_s9, 3072, %s194_s13, [#allocation8], %s1625_s10, %s1625_s10, %s1411_s11  }
  0x14   : > { %p36_p12 = scmp.ne.s32.totalorder %s1403_s20, %s1399_s19  ;;  %p27_p13 = scmp.eq.s32.totalorder %s26_s16, 0 }
  0x15   : > { %p37_p0 = scmp.eq.s32.totalorder %s1407_s21, 0  ;;  %p1203_p5 = scmp.lt.s32.totalorder %s1407_s21, 2 }
  0x16   : > { %p1517_p3 = por %p150_p2, %p36_p12  ;;  %s210_s26 = sand.u32 1, %s1403_s20  }
  0x17   : > { %s1523_s23 = scalar_select %p27_p13, %s1403_s20, %s29_s15  }
  0x18   : > { %p38_p7 = por %p37_p0, %p36_p12  ;;  %s940_s27 = sshll.u32 %s210_s26, 3 }
  0x19   : > { %s1108_s28 = sshll.u32 %s1407_s21, 3  ;;  %s214_s8 = scalar_lea.vmem [#allocation4], %s940_s27 }
  0x1a   : > { %s219_s7 = scalar_lea.hbm %s1619_s0, %s1108_s28  ;;  %s222_s9 = sshll.u32 %s214_s8, 4  ;;  %s223_s9 = int_to_ptr.vmem [resolvable:$true] %s222_s9 }
  0x1b   : > { %s220_s12 = sshll.u32 %s219_s7, 4  ;;  %p1530_p2 = pnand %p1203_p5, %p38_p7  ;;  %s221_s12 = int_to_ptr.hbm [resolvable:$true] %s220_s12 }
  0x1c   : > { %s211_s15 = scalar_lea.sflag [#allocation5], %s210_s26  ;;  %s1307_s16 = sshra.s32 %s221_s12, 4  ;;  %s1308_s16 = int_to_ptr.hbm [resolvable:$true] %s1307_s16 }
  0x1d   : > { %s1309_s10 = scalar_lea.hbm %s1308_s16, 8  ;;  %p1311_p10 = pneg %p1530_p2 }
  0x1e   : > { %p1310_p9 = scmp.ne.s32.totalorder %s1308_s16, %s1309_s10  ;;  %s1314_s30 = scalar_lea.hbm %s1619_s0, 16 }
  0x1f   : > { %p1315_p0 = scmp.lt.s32.totalorder %s1308_s16, %s1619_s0  ;;  %p1316_p5 = scmp.lt.s32.totalorder %s1314_s30, %s1309_s10 }
  0x20   : > { %p1312_p12 = pnand %p1311_p10, %p1310_p9 }
  0x21   : > { %p1317_p7 = por %p1316_p5, %p1315_p0 }
  0x22   : > { %p1313_p13 = pneg %p1312_p12 }
  0x24   : > { %p1318_p11 = pnand %p1317_p7, %p1313_p13 }
  0x26   : > { %1321 = shalt.err (!%p1318_p11)
}
  0x27   : > { %s1631_s26 = smov 64   ;;  %234 = sbr.rel (%p1488_p8) target bundleno = 391 (0x187), region = 40 }
  0x28   : > { %1196 = dma.hbm_to_vmem [thread:$0]  (!%p1530_p2), %s221_s12, 128, %s223_s9, %s211_s15, %s1631_s26, %s1631_s26, %s1411_s11  }
  0x29   : > { %s1550_s8 = sand.u32 (!%p1488_p8), 1, %s1399_s19  }
  0x2a   : > { %s944_s16 = sshll.u32 (!%p1488_p8), %s1550_s8, 3  ;;  %s237_s10 = scalar_lea.sflag (!%p1488_p8), [#allocation5], %s1550_s8 }
  0x2b   : > { %s240_s28 = scalar_lea.vmem (!%p1488_p8), [#allocation4], %s944_s16 }
  0x2c   : > { %1382 = dma.done.wait (%p1475_p4), %s237_s10, 128  }
  0x2d   : > { %1384 = vsyncadd (%p1475_p4), %s237_s10, 4294967168 }
  0x2e   : > { %1386 = dma.done.wait (%p43_p1), [#allocation8], 4608  }
  0x2f   : > { %1388 = vsyncadd (%p43_p1), [#allocation8], 4294962688  ;;  %vm279_vm0 = vcmask 519171   ;;  %vm280_vm1 = vsmask.f32 7950  ;;  %v1116_v0 = vld [vmem:[#allocation7 + $0x38] sm:$0xff] }
  0x30   : > { %v1112_v1 = vld [vmem:[#allocation7 + $0x18] sm:$0xff]  ;;  %vm293_vm2 = vcmask 519168   ;;  %vm285_vm3 = vcmask 516096   ;;  %vm286_vm4 = vsmask.f32 256  ;;  %v1115_v2 = vld [vmem:[#allocation7 + $0x30] sm:$0xff]  ;;  %vm1563_vm5 = vmand %vm279_vm0, %vm280_vm1  ;;  %353 = vmatpush.bf16.msra.mxu2 %v1116_v0 }
  0x31   : > { %416 = vmatpush.bf16.msra.mxu1 %v1112_v1  ;;  %v1111_v4 = vld [vmem:[#allocation7 + $0x10] sm:$0xff]  ;;  %vm287_vm6 = vmand %vm285_vm3, %vm286_vm4  ;;  %v282_v7 = vld [vmem:[#allocation2 + $0x4] sm:$0x8]  ;;  %vm345_vm7 = vcmask 523264   ;;  %vm367_vm8 = vsmask.f32 4352 }
  0x32   : > { %v291_v5 = vld [vmem:[%s240_s28] sm:$0xf]  ;;  %v292_v6 = vld [vmem:[%s240_s28 + $0x4] sm:$0xf]  ;;  %v1114_v8 = vld [vmem:[#allocation7 + $0x28] sm:$0xff]  ;;  %v283_v9 = vsel %vm1563_vm5, 0, %v282_v7 }
  0x33   : > { %294 = vst.msk [vmem:[#allocation2 + $0x8] sm:$0xf] %vm293_vm2, %v291_v5  ;;  %v288_v10 = vld [vmem:[#allocation2 + $0x10] sm:$0x1]  ;;  %v1110_v11 = vld [vmem:[#allocation7 + $0x8] sm:$0xff]  ;;  %v1113_v13 = vld [vmem:[#allocation7 + $0x20] sm:$0xff] }
  0x34   : > { %295 = vst.msk [vmem:[#allocation2 + $0xc] sm:$0xf] %vm293_vm2, %v292_v6  ;;  %354 = vmatpush.bf16.msra.mxu2 %v1115_v2  ;;  %v289_v12 = vsel %vm287_vm6, 0, %v288_v10  ;;  %v1109_v14 = vld [vmem:[#allocation7] sm:$0xff]  ;;  %v1121_v16 = vld [vmem:[#allocation7 + $0x58] sm:$0xff]  ;;  %v1120_v24 = vld [vmem:[#allocation7 + $0x50] sm:$0xff] }
  0x35   : > { %417 = vmatpush.bf16.msra.mxu1 %v1111_v4  ;;  %284 = vst [vmem:[#allocation2 + $0x4] sm:$0x8] %v283_v9  ;;  %v1119_v36 = vld [vmem:[#allocation7 + $0x48] sm:$0xff]  ;;  %v1118_v43 = vld [vmem:[#allocation7 + $0x40] sm:$0xff]  ;;  %vm446_vm9 = vsmask.f32 7424 }
  0x36   : > { %290 = vst [vmem:[#allocation2 + $0x10] sm:$0x1] %v289_v12  ;;  %v1137_v47 = vld [vmem:[#allocation9 + $0x78] sm:$0xff]  ;;  %v1136_v48 = vld [vmem:[#allocation9 + $0x70] sm:$0xff]  ;;  %v1135_v49 = vld [vmem:[#allocation9 + $0x68] sm:$0xff]  ;;  %vm515_vm10 = vcmask 1040384  }
  0x37   : > { %614 = vmatpush.bf16.msra.mxu3 %v1137_v47  ;;  %v1134_v50 = vld [vmem:[#allocation9 + $0x60] sm:$0xff]  ;;  %v1146_v51 = vld [vmem:[#allocation9 + $0xb8] sm:$0xff]  ;;  %v1145_v54 = vld [vmem:[#allocation9 + $0xb0] sm:$0xff]  ;;  %vm510_vm12 = vcmask 1043459   ;;  %s947_s12 = sshll.u32 %s1550_s8, 4  ;;  %s1147_s13 = sshll.u32 %s1466_s22, 4 }
  0x38   : > { %355 = vmatpush.bf16.msra.mxu2 %v1114_v8  ;;  %v1133_v52 = vld [vmem:[#allocation9 + $0x58] sm:$0xff]  ;;  %v1132_v55 = vld [vmem:[#allocation9 + $0x50] sm:$0xff]  ;;  %v1144_v57 = vld [vmem:[#allocation9 + $0xa8] sm:$0xff]  ;;  %s839_s30 = scalar_lea.hbm %s1624_s5, %s1147_s13  ;;  %s277_s6 = scalar_lea.vmem [#allocation10], %s947_s12 }
  0x39   : > { %418 = vmatpush.bf16.msra.mxu1 %v1110_v11  ;;  %v1129_v53 = vld [vmem:[#allocation9 + $0x38] sm:$0xff]  ;;  %v1128_v56 = vld [vmem:[#allocation9 + $0x30] sm:$0xff]  ;;  %v1131_v58 = vld [vmem:[#allocation9 + $0x48] sm:$0xff]  ;;  %s840_s7 = sshll.u32 %s277_s6, 4  ;;  %s842_s26 = sshll.u32 %s839_s30, 4  ;;  %s841_s7 = int_to_ptr.vmem [resolvable:$true] %s840_s7  ;;  %s843_s26 = int_to_ptr.hbm [resolvable:$true] %s842_s26 }
  0x3a   : > { %v1172_v17 = vld [vmem:[#allocation2 + $0x4] sm:$0xf0]   ;;  %698 = vmatpush.bf16.msra.mxu0 %v1129_v53  ;;  %v1127_v59 = vld [vmem:[#allocation9 + $0x28] sm:$0xff]  ;;  %v1143_v60 = vld [vmem:[#allocation9 + $0xa0] sm:$0xff]  ;;  %s828_s22 = scalar_lea.sflag [#allocation6], %s1550_s8  ;;  %s1351_s16 = sshra.s32 %s843_s26, 4  ;;  %s1352_s16 = int_to_ptr.hbm [resolvable:$true] %s1351_s16 }
  0x3b   : > { %v1161_v15 = vld [vmem:[#allocation2 + $0x8] sm:$0xff]   ;;  %615 = vmatpush.bf16.msra.mxu3 %v1136_v48  ;;  %v1130_v61 = vld [vmem:[#allocation9 + $0x40] sm:$0xff]  ;;  %vm516_vm11 = vmand %vm515_vm10, %vm286_vm4  ;;  %s1353_s10 = scalar_lea.hbm %s1352_s16, 16  ;;  %s1357_s29 = scalar_lea.hbm %s1624_s5, 32 }
  0x3c   : > { %v1151_v18 = vunpack.c.h.b16 %v1161_v15  ;;  %v1164_v19 = vld [vmem:[#allocation2 + $0x4] sm:$0x8]  ;;  %v1117_v20 = vld [vmem:[#allocation2 + $0x8] sm:$0xff]  ;;  %356 = vmatpush.bf16.msra.mxu2 %v1113_v13  ;;  %v1126_v62 = vld [vmem:[#allocation9 + $0x20] sm:$0xff]  ;;  %p1354_p1 = scmp.ne.s32.totalorder %s1352_s16, %s1353_s10  ;;  %p1358_p11 = scmp.lt.s32.totalorder %s1352_s16, %s1624_s5 }
  0x3d   : > { %419 = vmatpush.bf16.msra.mxu1 %v1109_v14  ;;  %v1165_v22 = vor.u32 %v1172_v17, %v1164_v19  ;;  %v428_v23 = vld [vmem:[#allocation2 + $0x10] sm:$0x1]  ;;  %v450_v31 = vshll.u32 %v1117_v20, 16  ;;  %v448_v40 = vshrl.u32 %v1117_v20, 16  ;;  %v517_v63 = vld [vmem:[#allocation3 + $0x10] sm:$0x1]  ;;  %vm511_vm13 = vmand %vm510_vm12, %vm280_vm1  ;;  %p1359_p2 = scmp.lt.s32.totalorder %s1357_s29, %s1353_s10 }
  0x3e   : > { %v366_v21 = vpack.c.b16 %v1151_v18, %v1151_v18  ;;  %v443_v25 = vunpack.c.l.b16 %v428_v23  ;;  %699 = vmatpush.bf16.msra.mxu0 %v1128_v56  ;;  %v518_v0 = vsel %vm516_vm11, 0, %v517_v63  ;;  %v512_v1 = vld [vmem:[#allocation3 + $0x4] sm:$0x8]  ;;  %v1142_v3 = vld [vmem:[#allocation9 + $0x98] sm:$0xff]  ;;  %v1141_v6 = vld [vmem:[#allocation9 + $0x90] sm:$0xff]  ;;  %p1355_p4 = pnand %p1354_p1, %p1517_p3 }
  0x3f   : > { %v369_v28 = vshrl.u32 %v1165_v22, 16  ;;  %v372_v29 = vshll.u32 %v1165_v22, 16  ;;  %964 = vmatmul.msk.bf16.vlgmr.msra.gmra.mxu2 %vm345_vm7, %v1161_v15  ;;  %v452_v41 = vrot.slane %v450_v31, 1  ;;  %616 = vmatpush.bf16.msra.mxu3 %v1135_v49  ;;  %519 = vst [vmem:[#allocation3 + $0x10] sm:$0x1] %v518_v0  ;;  %v513_v4 = vsel %vm511_vm13, 0, %v512_v1  ;;  %p1360_p9 = por %p1359_p2, %p1358_p11 }
  0x40   : > { %490 = vmatpush.bf16.msrb.mxu2 %v1121_v16  ;;  %v377_v26 = vshrl.u32 %v366_v21, 16  ;;  %v380_v27 = vshll.u32 %v366_v21, 16  ;;  %v445_v30 = vpack.c.b16 %v443_v25, %v443_v25  ;;  %v1125_v5 = vld [vmem:[#allocation9 + $0x18] sm:$0xff]  ;;  %514 = vst [vmem:[#allocation3 + $0x4] sm:$0x8] %v513_v4  ;;  %v1124_v7 = vld [vmem:[#allocation9 + $0x10] sm:$0xff]  ;;  %p1356_p8 = pneg %p1355_p4 }
  0x41   : > { %v371_v34 = vrot.slane %v369_v28, 3  ;;  %v374_v35 = vrot.slane %v372_v29, 4  ;;  %v453_v44 = vor.u32 %v452_v41, %v448_v40  ;;  %801 = vmatpush.bf16.msrb.mxu1 %v1146_v51  ;;  %v1140_v8 = vld [vmem:[#allocation9 + $0x88] sm:$0xff]  ;;  %v1139_v12 = vld [vmem:[#allocation9 + $0x80] sm:$0xff] }
  0x42   : > { %v379_v32 = vrot.slane %v377_v26, 3  ;;  %v382_v33 = vrot.slane %v380_v27, 4  ;;  %v455_v42 = vshll.u32 %v445_v30, 16  ;;  %700 = vmatpush.bf16.msra.mxu0 %v1127_v59  ;;  %v1123_v9 = vld [vmem:[#allocation9 + $0x8] sm:$0xff]  ;;  %v1122_v13 = vld [vmem:[#allocation9] sm:$0xff]  ;;  %p1361_p10 = pnand %p1360_p9, %p1356_p8 }
  0x43   : > { %v375_v37 = vor.u32 %v374_v35, %v371_v34  ;;  %617 = vmatpush.bf16.msra.mxu3 %v1134_v50  ;;  %v1245_v18 = vld [vmem:[%s1621_s2] ss:$0 sm:$0xff] }
  0x44   : > { %491 = vmatpush.bf16.msrb.mxu2 %v1120_v24  ;;  %v383_v38 = vor.u32 %v382_v33, %v379_v32  ;;  %v457_v45 = vrot.slane %v455_v42, 1 }
  0x45   : > { %802 = vmatpush.bf16.msrb.mxu1 %v1145_v54 }
  0x46   : > { %v384_v39 = vsel %vm367_vm8, %v375_v37, %v383_v38  ;;  %v458_v46 = vsel %vm446_vm9, %v453_v44, %v457_v45  ;;  %701 = vmatpush.bf16.msra.mxu0 %v1126_v62  ;;  %v714_v26 = vld [vmem:[#allocation3 + $0x10] sm:$0x1] }
  0x47   : > { %981 = vmatmul.msk.bf16.vlgmr.msra.gmra.mxu1 %vm345_vm7, %v384_v39  ;;  %618 = vmatpush.bf16.msra.mxu3 %v1133_v52  ;;  %v737_v28 = vunpack.c.l.b16 %v714_v26  ;;  %v1170_v32 = vld [vmem:[#allocation3 + $0x4] sm:$0x8] }
  0x48   : > { %492 = vmatpush.bf16.msrb.mxu2 %v1119_v36 }
  0x49   : > { %803 = vmatpush.bf16.msrb.mxu1 %v1144_v57  ;;  %v739_v31 = vpack.c.b16 %v737_v28, %v737_v28 }
  0x4a   : > { %702 = vmatpush.bf16.msra.mxu0 %v1125_v5 }
  0x4b   : > { %619 = vmatpush.bf16.msra.mxu3 %v1132_v55  ;;  %v748_v36 = vshll.u32 %v739_v31, 16 }
  0x4c   : > { %493 = vmatpush.bf16.msrb.mxu2 %v1118_v43 }
  0x4d   : > { %804 = vmatpush.bf16.msrb.mxu1 %v1143_v60 }
  0x4e   : > { %703 = vmatpush.bf16.msra.mxu0 %v1124_v7 }
  0x4f   : > { %1002 = vmatmul.msk.bf16.vlgmr.msrb.gmra.mxu2 %vm345_vm7, %v458_v46  ;;  %620 = vmatpush.bf16.msra.mxu3 %v1131_v58  ;;  %v750_v46 = vrot.slane %v748_v36, 1  ;;  %v1246_v58 = vld [vmem:[%s1623_s4] ss:$0 sm:$0xff] }
  0x51   : > { %805 = vmatpush.bf16.msrb.mxu1 %v1142_v3 }
  0x52   : > { %704 = vmatpush.bf16.msra.mxu0 %v1123_v9 }
  0x53   : > { %621 = vmatpush.bf16.msra.mxu3 %v1130_v61 }
  0x55   : > { %806 = vmatpush.bf16.msrb.mxu1 %v1141_v6 }
  0x56   : > { %705 = vmatpush.bf16.msra.mxu0 %v1122_v13 }
  0x59   : > { %807 = vmatpush.bf16.msrb.mxu1 %v1140_v8 }
  0x5d   : > { %808 = vmatpush.bf16.msrb.mxu1 %v1139_v12 }
  0xc2   : > { %v358_v2 = vpop.f32.mrf.mxu2 }
  0xc4   : > { %v421_v11 = vpop.f32.mrf.mxu1 }
  0xc5   : > { %v422_v15 = vadd.f32 %v421_v11, %v358_v2 }
  0xca   : > { %v360_v10 = vpop.f32.mrf.mxu2 }
  0xcc   : > { %v423_v16 = vpop.f32.mrf.mxu1 }
  0xcd   : > { %v424_v19 = vadd.f32 %v423_v16, %v360_v10 }
  0xd2   : > { %v495_v14 = vpop.f32.mrf.mxu2 }
  0xd3   : > { %v500_v17 = vadd.f32 %v495_v14, %v422_v15 }
  0xd5   : > { %v506_v21 = vadd.f32 %v1245_v18, %v500_v17 }
  0xd7   : > { %v508_v24 = vmax.f32 %v506_v21, 0.0 }
  0xda   : > { %v497_v20 = vpop.f32.mrf.mxu2 }
  0xdb   : > { %v501_v22 = vadd.f32 %v497_v20, %v424_v19 }
  0xdd   : > { %v507_v23 = vadd.f32 %v1245_v18, %v501_v22 }
  0xdf   : > { %v509_v25 = vmax.f32 %v507_v23, 0.0 }
  0xe1   : > { %v1155_v27 = vpack.c.bf16 %v509_v25, %v508_v24 }
  0xe3   : > { %1166 = vst [vmem:[#allocation3 + $0x8] sm:$0xff] %v1155_v27   ;;  %v1160_v29 = vunpack.c.h.b16 %v1155_v27  ;;  %622 = vmatmul.bf16.vlgmr.msra.gmra.mxu3 %v1155_v27 }
  0xe5   : > { %v631_v30 = vpack.c.b16 %v1160_v29, %v1160_v29 }
  0xe7   : > { %v641_v33 = vshrl.u32 %v631_v30, 16  ;;  %v644_v34 = vshll.u32 %v631_v30, 16 }
  0xe9   : > { %v643_v40 = vrot.slane %v641_v33, 3  ;;  %v646_v41 = vrot.slane %v644_v34, 4 }
  0xea   : > { %v1138_v35 = vld [vmem:[#allocation3 + $0x8] sm:$0xff] }
  0xeb   : > { %v1173_v37 = vld [vmem:[#allocation3 + $0x4] sm:$0xf0]   ;;  %v743_v39 = vshll.u32 %v1138_v35, 16  ;;  %v741_v44 = vshrl.u32 %v1138_v35, 16  ;;  %v647_v51 = vor.u32 %v646_v41, %v643_v40 }
  0xec   : > { %v1171_v38 = vor.u32 %v1173_v37, %v1170_v32 }
  0xed   : > { %v745_v45 = vrot.slane %v743_v39, 1 }
  0xee   : > { %v633_v42 = vshrl.u32 %v1171_v38, 16  ;;  %v636_v43 = vshll.u32 %v1171_v38, 16 }
  0xef   : > { %v746_v49 = vor.u32 %v745_v45, %v741_v44 }
  0xf0   : > { %v635_v47 = vrot.slane %v633_v42, 3  ;;  %v638_v48 = vrot.slane %v636_v43, 4 }
  0xf1   : > { %v751_v52 = vsel %vm446_vm9, %v746_v49, %v750_v46 }
  0xf2   : > { %v639_v50 = vor.u32 %v638_v48, %v635_v47  ;;  %809 = vmatmul.bf16.vlgmr.msrb.gmra.mxu1 %v751_v52 }
  0xf4   : > { %v648_v53 = vsel %vm367_vm8, %v639_v50, %v647_v51 }
  0xf5   : > { %706 = vmatmul.bf16.vlgmr.msra.gmra.mxu0 %v648_v53 }
 0x166   : > { %v623_v54 = vpop.f32.mrf.mxu3 }
 0x16e   : > { %v625_v62 = vpop.f32.mrf.mxu3 }
 0x16f   : > { %v810_v55 = vpop.f32.mrf.mxu1 }
 0x172   : > { %v707_v56 = vpop.f32.mrf.mxu0 }
 0x173   : > { %v708_v57 = vadd.f32 %v707_v56, %v623_v54 }
 0x175   : > { %v815_v59 = vadd.f32 %v810_v55, %v708_v57 }
 0x177   : > { %v821_v60 = vadd.f32 %v1246_v58, %v815_v59  ;;  %v812_v1 = vpop.f32.mrf.mxu1 }
 0x179   : > { %v823_v61 = vmax.f32 %v821_v60, 0.0 }
 0x17a   : > { %v709_v63 = vpop.f32.mrf.mxu0 }
 0x17b   : > { %825 = vst [vmem:[%s277_s6] sm:$0xff] %v823_v61  ;;  %v710_v0 = vadd.f32 %v709_v63, %v625_v62 }
 0x17d   : > { %v816_v2 = vadd.f32 %v812_v1, %v710_v0 }
 0x17f   : > { %v822_v3 = vadd.f32 %v1246_v58, %v816_v2 }
 0x181   : > { %v824_v4 = vmax.f32 %v822_v3, 0.0 }
 0x183   : > { %826 = vst [vmem:[%s277_s6 + $0x8] sm:$0xff] %v824_v4 }
 0x184   : > { %1364 = shalt.err (!%p1361_p10)
}
 0x185   : > { %s1413_s8 = smov 128   ;;  %s1414_s12 = smov 8  }
 0x186   : > { %1184 = dma.vmem_to_hbm [thread:$0]  (%p1517_p3), %s841_s7, 256, %s843_s26, %s828_s22, %s1413_s8, %s1413_s8, %s1414_s12  }
 0x187 PF: > { %s857_s13 = sand.u32 1, %s1395_s18   ;;  %p1634_p12 = scmp.ge.s32.totalorder %s1407_s21, 2 }
 0x188   : > { %s858_s15 = scalar_lea.sflag [#allocation6], %s857_s13 }
 0x189   : > { %p1198_p13 = pnand %p1634_p12, %p1480_p6 }
 0x18b   : > { %p1199_p0 = pneg %p1198_p13 }
 0x18d   : > { %1390 = dma.done.wait (%p1199_p0), %s858_s15, 256  }
 0x18e   : > { %1392 = vsyncadd (%p1199_p0), %s858_s15, 4294967040  ;;  %p19_p5 = scmp.ge.s32.totalorder %s1507_s14, 4   ;;  %s1635_s18 = smov %s1399_s19 }
 0x18f   : > { %s1636_s19 = smov %s1403_s20  ;;  %s1637_s20 = smov %s1523_s23 }
 0x190   : > { %s1638_s21 = smov %s1507_s14  ;;  %21 = sbr.rel (!%p19_p5) target bundleno = 6 (0x6), region = 97 }
 0x195   :  { %864 = vsyncpa [#allocation5], 1 }
 0x196   :  { %866 = vsyncpa [#allocation5 + $0x1], 1 }
 0x197   :  { %867 = vsyncpa [#allocation8], 1 }
 0x198   :  { %868 = vsyncpa [#allocation6], 1 }
 0x199   :  { %870 = vsyncpa [#allocation6 + $0x1], 1 }

</bundles_post_ra>
